<compile_context>
chip_gen: v5e
topology: v5e:2x2
jax: 0.10.0
libtpu: 0.0.40
codegen_flags: <defaults>
</compile_context>

<pallas_src>
import functools

import jax
import jax.numpy as jnp
from jax.experimental import pallas as pl
from jax.experimental.pallas import tpu as pltpu


def _round_up(n, m):
    return ((n + m - 1) // m) * m


def _act_kernel(x_ref, w_ref, b_ref, avail_ref, *rest, deterministic):
    if deterministic:
        actions_ref, logp_ref = rest
        noise_ref = None
    else:
        noise_ref, actions_ref, logp_ref = rest

    # Linear head on the MXU: [B_t, D] @ [D, A_pad] (+ bias), f32 accumulation.
    logits = jnp.dot(x_ref[...], w_ref[...],
                     preferred_element_type=jnp.float32) + b_ref[...]

    # Mask unavailable (and padded) actions, same as `x[avail == 0] = -1e10`.
    masked = jnp.where(avail_ref[...] != 0, logits, jnp.float32(-1e10))

    bt, ap = masked.shape
    col = jax.lax.broadcasted_iota(jnp.int32, (bt, ap), 1)

    # mode() or sample() via the Gumbel-max trick.
    score = masked if deterministic else masked + noise_ref[...]
    score_max = jnp.max(score, axis=-1, keepdims=True)
    action = jnp.min(jnp.where(score == score_max, col, ap),
                     axis=-1, keepdims=True)

    # log-softmax denominator of the masked logits.
    m = jnp.max(masked, axis=-1, keepdims=True)
    z = masked - m
    lse = jnp.log(jnp.sum(jnp.exp(z), axis=-1, keepdims=True))
    if deterministic:
        # The chosen action is the argmax of `masked`, so z[action] == 0 exactly.
        logp = -lse
    else:
        logp = jnp.sum(jnp.where(col == action, z, 0.0),
                       axis=-1, keepdims=True) - lse

    actions_ref[...] = action.astype(jnp.int32)
    logp_ref[...] = logp


def act_layer_forward(x, weight, bias, available_actions=None,
                      deterministic=False, key=None):
    """Pallas implementation of ACTLayer.forward (Categorical action head).

    x: [B, D], weight: [A, D] (PyTorch nn.Linear layout), bias: [A],
    available_actions: [B, A] (nonzero = available).  Returns
    (actions [B,1] int32, action_log_probs [B,1] float32).
    """
    B, D = x.shape
    A = weight.shape[0]
    dtype = x.dtype

    # Pad the action dim to a full lane width (multiple of 128).
    A_pad = _round_up(A, 128)

    # Batch tile: multiple of 32 (clean int8 sublane packing), sized so the
    # double-buffered input tiles stay well inside VMEM even on v7x (64 MiB).
    noise_bytes = 0 if deterministic else A_pad * 4
    bytes_per_row = D * dtype.itemsize + A_pad + noise_bytes + 8
    budget = 8 * 1024 * 1024
    B_t = max(32, min(512, (budget // (2 * bytes_per_row)) // 32 * 32))
    B_t = min(B_t, _round_up(B, 32))
    B_pad = _round_up(B, B_t)
    grid = (B_pad // B_t,)

    # One-time wrapper-side layout work: transpose/pad weight, pad bias & mask.
    w_t = jnp.zeros((D, A_pad), dtype).at[:, :A].set(weight.T.astype(dtype))
    b_pad = jnp.zeros((1, A_pad), jnp.float32).at[0, :A].set(
        bias.reshape(-1).astype(jnp.float32))

    if available_actions is None:
        avail = jnp.zeros((B, A_pad), jnp.int8).at[:, :A].set(1)
    else:
        avail = jnp.zeros((B, A_pad), jnp.int8).at[:, :A].set(
            (available_actions > 0).astype(jnp.int8))

    if B_pad != B:
        x = jnp.pad(x, ((0, B_pad - B), (0, 0)))
        avail = jnp.pad(avail, ((0, B_pad - B), (0, 0)))  # padded rows fully masked

    row_spec = pl.BlockSpec((B_t, A_pad), lambda i: (i, 0))
    in_specs = [
        pl.BlockSpec((B_t, D), lambda i: (i, 0)),      # x tile (pipelined)
        pl.BlockSpec((D, A_pad), lambda i: (0, 0)),    # weight (resident)
        pl.BlockSpec((1, A_pad), lambda i: (0, 0)),    # bias (resident)
        row_spec,                                      # availability mask (int8)
    ]
    args = [x, w_t, b_pad, avail]

    if not deterministic:
        # TODO(synk): noise is drawn host-side with jax.random so the kernel also
        # runs under interpret mode; on real TPU this could instead use
        # pltpu.prng_seed(seed + pl.program_id(0)) + prng_random_bits to avoid
        # the extra HBM noise traffic (not bit-matching torch's RNG either way).
        if key is None:
            key = jax.random.PRNGKey(0)
        gumbel = jax.random.gumbel(key, (B_pad, A_pad), dtype=jnp.float32)
        in_specs.append(row_spec)
        args.append(gumbel)

    out_spec = pl.BlockSpec((B_t, 1), lambda i: (i, 0))
    actions, logp = pl.pallas_call(
        functools.partial(_act_kernel, deterministic=deterministic),
        grid=grid,
        in_specs=in_specs,
        out_specs=(out_spec, out_spec),
        out_shape=(jax.ShapeDtypeStruct((B_pad, 1), jnp.int32),
                   jax.ShapeDtypeStruct((B_pad, 1), jnp.float32)),
        compiler_params=pltpu.CompilerParams(
            dimension_semantics=("parallel",)),
    )(*args)
    return actions[:B], logp[:B]


def _reference_forward(x, weight, bias, available_actions):
    """Pure-JAX reference for the deterministic path."""
    logits = x @ weight.T + bias.reshape(1, -1)
    logits = jnp.where(available_actions > 0, logits, -1e10)
    actions = jnp.argmax(logits, axis=-1, keepdims=True)
    logsm = jax.nn.log_softmax(logits, axis=-1)
    logp = jnp.take_along_axis(logsm, actions, axis=-1)
    return actions.astype(jnp.int32), logp


if __name__ == "__main__":
    # Small shapes consistent with the module: inputs_dim=32, action_dim=6.
    B, D, A = 8, 32, 6
    gain = 0.01

    key = jax.random.PRNGKey(0)
    kx, kw, ka, ks = jax.random.split(key, 4)

    x = jax.random.normal(kx, (B, D), dtype=jnp.float32)
    weight = gain * jax.random.normal(kw, (A, D), dtype=jnp.float32)
    bias = jnp.zeros((A,), dtype=jnp.float32)
    available_actions = (jax.random.uniform(ka, (B, A)) > 0.3).astype(jnp.float32)
    available_actions = available_actions.at[:, 0].set(1.0)  # keep >=1 available

    # Deterministic path (mode) — check against the pure-JAX reference.
    actions_det, logp_det = act_layer_forward(
        x, weight, bias, available_actions, deterministic=True)
    jax.block_until_ready((actions_det, logp_det))
    ref_actions, ref_logp = _reference_forward(x, weight, bias, available_actions)
    assert actions_det.shape == (B, 1) and logp_det.shape == (B, 1)
    assert jnp.all(actions_det == ref_actions)
    assert jnp.allclose(logp_det, ref_logp, atol=1e-5)

    # Stochastic path (sample) — Gumbel-max; matches Categorical in distribution.
    actions_smp, logp_smp = act_layer_forward(
        x, weight, bias, available_actions, deterministic=False, key=ks)
    jax.block_until_ready((actions_smp, logp_smp))
    assert actions_smp.shape == (B, 1) and logp_smp.shape == (B, 1)
    assert jnp.all(jnp.take_along_axis(available_actions, actions_smp, axis=-1) > 0)
    assert jnp.all(jnp.isfinite(logp_smp))
    # Sampled log-prob must equal the masked log-softmax at the sampled action.
    logits_ref = jnp.where(available_actions > 0, x @ weight.T + bias, -1e10)
    logsm_ref = jax.nn.log_softmax(logits_ref, axis=-1)
    assert jnp.allclose(
        logp_smp, jnp.take_along_axis(logsm_ref, actions_smp, axis=-1), atol=1e-5)

    print("KERNEL_OK")
</pallas_src>

<mosaic_0001>
module attributes {stable_mosaic.version = 11 : i64} {
  func.func @_act_kernel(%arg0: i32, %arg1: memref<32x32xf32, #tpu.memory_space<vmem>>, %arg2: memref<32x128xf32, #tpu.memory_space<vmem>>, %arg3: memref<1x128xf32, #tpu.memory_space<vmem>>, %arg4: memref<32x128xi8, #tpu.memory_space<vmem>>, %arg5: memref<32x1xi32, #tpu.memory_space<vmem>>, %arg6: memref<32x1xf32, #tpu.memory_space<vmem>>) attributes {dimension_semantics = [#tpu.dimension_semantics<parallel>], iteration_bounds = array<i64: 1>, scalar_prefetch = 0 : i64, scratch_operands = 0 : i64, tpu.core_type = #tpu.core_type<tc>, window_params = [{transform_indices = @transform_0, window_bounds = array<i64: 32, 32>}, {pipeline_mode = #tpu.pipeline_mode<synchronous>, transform_indices = @transform_1, window_bounds = array<i64: 32, 128>}, {pipeline_mode = #tpu.pipeline_mode<synchronous>, transform_indices = @transform_2, window_bounds = array<i64: 1, 128>}, {transform_indices = @transform_3, window_bounds = array<i64: 32, 128>}, {transform_indices = @transform_4, window_bounds = array<i64: 32, 1>}, {transform_indices = @transform_5, window_bounds = array<i64: 32, 1>}]} {
    %c0 = arith.constant 0 : index
    %c0_0 = arith.constant 0 : index
    %0 = vector.load %arg1[%c0, %c0_0] : memref<32x32xf32, #tpu.memory_space<vmem>>, vector<32x32xf32>
    %c0_1 = arith.constant 0 : index
    %c0_2 = arith.constant 0 : index
    %1 = vector.load %arg2[%c0_1, %c0_2] : memref<32x128xf32, #tpu.memory_space<vmem>>, vector<32x128xf32>
    %cst = arith.constant dense<0.000000e+00> : vector<32x128xf32>
    %2 = tpu.matmul %0, %1, %cst {dimension_numbers = #tpu.dot_dimension_numbers<[1], [0], [0], [1], [0, 0, 1, 1], [], []>} : vector<32x32xf32>, vector<32x128xf32>, vector<32x128xf32> -> vector<32x128xf32>
    %c0_3 = arith.constant 0 : index
    %c0_4 = arith.constant 0 : index
    %3 = vector.load %arg3[%c0_3, %c0_4] : memref<1x128xf32, #tpu.memory_space<vmem>>, vector<1x128xf32>
    %4 = vector.broadcast %3 : vector<1x128xf32> to vector<32x128xf32>
    %5 = arith.addf %2, %4 : vector<32x128xf32>
    %c0_5 = arith.constant 0 : index
    %c0_6 = arith.constant 0 : index
    %6 = vector.load %arg4[%c0_5, %c0_6] : memref<32x128xi8, #tpu.memory_space<vmem>>, vector<32x128xi8>
    %c0_i8 = arith.constant 0 : i8
    %7 = vector.broadcast %c0_i8 : i8 to vector<32x128xi8>
    %8 = arith.cmpi ne, %6, %7 : vector<32x128xi8>
    %cst_7 = arith.constant -1.000000e+10 : f32
    %9 = vector.broadcast %cst_7 : f32 to vector<32x128xf32>
    %10 = arith.select %8, %5, %9 : vector<32x128xi1>, vector<32x128xf32>
    %11 = tpu.iota {dimensions = array<i32: 1>} : vector<32x128xi32>
    %cst_8 = arith.constant dense<0xFF800000> : vector<32xf32>
    %12 = vector.multi_reduction <maximumf>, %10, %cst_8 [1] : vector<32x128xf32> to vector<32xf32>
    %13 = vector.shape_cast %12 : vector<32xf32> to vector<32x1xf32>
    %14 = vector.broadcast %13 : vector<32x1xf32> to vector<32x128xf32>
    %15 = arith.cmpf oeq, %10, %14 : vector<32x128xf32>
    %c128_i32 = arith.constant 128 : i32
    %16 = vector.broadcast %c128_i32 : i32 to vector<32x128xi32>
    %17 = arith.select %15, %11, %16 : vector<32x128xi1>, vector<32x128xi32>
    %cst_9 = arith.constant dense<2147483647> : vector<32xi32>
    %18 = vector.multi_reduction <minsi>, %17, %cst_9 [1] : vector<32x128xi32> to vector<32xi32>
    %19 = vector.shape_cast %18 : vector<32xi32> to vector<32x1xi32>
    %cst_10 = arith.constant dense<0xFF800000> : vector<32xf32>
    %20 = vector.multi_reduction <maximumf>, %10, %cst_10 [1] : vector<32x128xf32> to vector<32xf32>
    %21 = vector.shape_cast %20 : vector<32xf32> to vector<32x1xf32>
    %22 = vector.broadcast %21 : vector<32x1xf32> to vector<32x128xf32>
    %23 = arith.subf %10, %22 : vector<32x128xf32>
    %24 = math.exp %23 : vector<32x128xf32>
    %cst_11 = arith.constant dense<0.000000e+00> : vector<32xf32>
    %25 = vector.multi_reduction <add>, %24, %cst_11 [1] : vector<32x128xf32> to vector<32xf32>
    %26 = vector.shape_cast %25 : vector<32xf32> to vector<32x1xf32>
    %27 = math.log %26 : vector<32x1xf32>
    %cst_12 = arith.constant 0.000000e+00 : f32
    %28 = vector.broadcast %cst_12 : f32 to vector<32x1xf32>
    %29 = arith.subf %28, %27 : vector<32x1xf32>
    %c0_13 = arith.constant 0 : index
    %c0_14 = arith.constant 0 : index
    %30 = vector.load %arg5[%c0_13, %c0_14] : memref<32x1xi32, #tpu.memory_space<vmem>>, vector<32x1xi32>
    tpu.vector_store %arg5[%c0_13, %c0_14], %19 {strides = array<i32>} : memref<32x1xi32, #tpu.memory_space<vmem>>, vector<32x1xi32>,
    %c0_15 = arith.constant 0 : index
    %c0_16 = arith.constant 0 : index
    %31 = vector.load %arg6[%c0_15, %c0_16] : memref<32x1xf32, #tpu.memory_space<vmem>>, vector<32x1xf32>
    tpu.vector_store %arg6[%c0_15, %c0_16], %29 {strides = array<i32>} : memref<32x1xf32, #tpu.memory_space<vmem>>, vector<32x1xf32>,
    return
  }
  func.func @transform_0(%arg0: i32) -> (i32, i32) {
    %c0_i32 = arith.constant 0 : i32
    %c0_i32_0 = arith.constant 0 : i32
    return %arg0, %c0_i32 : i32, i32
  }
  func.func @transform_1(%arg0: i32) -> (i32, i32) {
    %c0_i32 = arith.constant 0 : i32
    %c0_i32_0 = arith.constant 0 : i32
    %c0_i32_1 = arith.constant 0 : i32
    return %c0_i32, %c0_i32_0 : i32, i32
  }
  func.func @transform_2(%arg0: i32) -> (i32, i32) {
    %c0_i32 = arith.constant 0 : i32
    %c0_i32_0 = arith.constant 0 : i32
    %c0_i32_1 = arith.constant 0 : i32
    return %c0_i32, %c0_i32_0 : i32, i32
  }
  func.func @transform_3(%arg0: i32) -> (i32, i32) {
    %c0_i32 = arith.constant 0 : i32
    %c0_i32_0 = arith.constant 0 : i32
    return %arg0, %c0_i32 : i32, i32
  }
  func.func @transform_4(%arg0: i32) -> (i32, i32) {
    %c0_i32 = arith.constant 0 : i32
    %c0_i32_0 = arith.constant 0 : i32
    return %arg0, %c0_i32 : i32, i32
  }
  func.func @transform_5(%arg0: i32) -> (i32, i32) {
    %c0_i32 = arith.constant 0 : i32
    %c0_i32_0 = arith.constant 0 : i32
    return %arg0, %c0_i32 : i32, i32
  }
}

</mosaic_0001>

<bundles_post_ra>
// kernel: tpu_custom_call.1
= control target key start
LH: loop header
LB: loop body
LE: loop exit
PB: predicated region body
PF: predicated region fallthrough
CT: control target
= control target key end

     0   :  { %11 = vsyncpa [#allocation3], 0  ;;  %s475_s0 = inlined_call_operand.hbm [shape: f32[32,32], index: 0, kind: input, shape index: {}]   ;;  %s476_s1 = inlined_call_operand.hbm [shape: f32[32,128], index: 1, kind: input, shape index: {}]   ;;  %s477_s2 = inlined_call_operand.vmem [shape: f32[1,128], index: 2, kind: input, shape index: {}]   ;;  %s478_s3 = inlined_call_operand.hbm [shape: s8[32,128], index: 3, kind: input, shape index: {}]   ;;  %s479_s4 = inlined_call_operand.vmem [shape: s32[32,1], index: 4, kind: output, shape index: {0}]   ;;  %s480_s5 = inlined_call_operand.vmem [shape: f32[32,1], index: 5, kind: output, shape index: {1}]  }
   0x1   :  { %12 = vsyncpa [#allocation5], 0  ;;  %s30_s20 = sshll.u32 %s476_s1, 4  ;;  %s395_s21 = smov [#allocation4]   ;;  %s31_s20 = int_to_ptr.hbm [resolvable:$true] %s30_s20 }
   0x2   :  { %s32_s22 = sshll.u32 %s395_s21, 4  ;;  %s17_s25 = sshll.u32 %s475_s0, 4  ;;  %s33_s22 = int_to_ptr.vmem [resolvable:$true] %s32_s22  ;;  %s18_s25 = int_to_ptr.hbm [resolvable:$true] %s17_s25 }
   0x3   :  { %s396_s26 = smov 128   ;;  %s397_s27 = smov 8  }
   0x4   :  { %38 = dma.hbm_to_vmem [thread:$0]  %s31_s20, 512, %s33_s22, [#allocation5], %s396_s26, %s396_s26, %s397_s27  }
   0x5   :  { %s398_s28 = smov [#allocation2]   ;;  %s46_s7 = sshll.u32 %s478_s3, 4  ;;  %s47_s7 = int_to_ptr.hbm [resolvable:$true] %s46_s7 }
   0x6   :  { %s19_s29 = sshll.u32 %s398_s28, 4  ;;  %s399_s1 = smov [#allocation6]   ;;  %s20_s29 = int_to_ptr.vmem [resolvable:$true] %s19_s29 }
   0x7   :  { %25 = dma.hbm_to_vmem [thread:$0]  %s18_s25, 512, %s20_s29, [#allocation3], %s396_s26, %s396_s26, %s397_s27  }
   0x8   :  { %s48_s8 = sshll.u32 %s399_s1, 4  ;;  %s49_s8 = int_to_ptr.vmem [resolvable:$true] %s48_s8 }
   0x9   :  { %51 = dma.hbm_to_vmem [thread:$0]  %s47_s7, 128, %s49_s8, [#allocation5]  }
   0xa   :  { %391 = dma.done.wait [#allocation3], 512  }
   0xb   :  { %392 = vsyncadd [#allocation3], 4294966784 }
   0xc   :  { %393 = dma.done.wait [#allocation5], 640  }
   0xd   :  { %394 = vsyncadd [#allocation5], 4294966656  ;;  %v73_v0 = vld [vmem:[#allocation4 + $0x18] sm:$0xff]  ;;  %v72_v1 = vld [vmem:[#allocation4 + $0x10] sm:$0xff]  ;;  %vm78_vm0 = vcmask 261120   ;;  %v400_v9 = vmov 0   ;;  %v155_v44 = vlaneseq }
   0xe   :  { %103 = vmatpush.msra.mxu0 %v73_v0  ;;  %285 = vmatpush.msra.mxu2 %v73_v0  ;;  %v71_v2 = vld [vmem:[#allocation4 + $0x8] sm:$0xff]  ;;  %v70_v3 = vld [vmem:[#allocation4] sm:$0xff]  ;;  %v68_v5 = vld [vmem:[#allocation2 + $0x10] sm:$0xff] }
   0xf   :  { %284 = vmatpush.msra.mxu1 %v73_v0  ;;  %286 = vmatpush.msra.mxu3 %v73_v0  ;;  %v66_v4 = vld [vmem:[#allocation2] sm:$0xff]  ;;  %v67_v6 = vld [vmem:[#allocation2 + $0x8] sm:$0xff]  ;;  %v69_v7 = vld [vmem:[#allocation2 + $0x18] sm:$0xff]  ;;  %v156_v45 = vand.u32 127, %v155_v44 }
  0x10   :  { %104 = vmatpush.msra.mxu0 %v72_v1  ;;  %288 = vmatpush.msra.mxu2 %v72_v1  ;;  %v120_v8 = vld [vmem:[#allocation6] sm:$0xff] }
  0x11   :  { %287 = vmatpush.msra.mxu1 %v72_v1  ;;  %289 = vmatpush.msra.mxu3 %v72_v1  ;;  %vm121_vm1 = vnez %v120_v8  ;;  %v302_v24 = vld [vmem:[%s477_s2] ss:$0 sm:$0xff] }
  0x12   :  { %105 = vmatpush.msra.mxu0 %v71_v2  ;;  %291 = vmatpush.msra.mxu2 %v71_v2  ;;  %v122_v10 = vsel %vm121_vm1, 16843009, %v400_v9 }
  0x13   :  { %290 = vmatpush.msra.mxu1 %v71_v2  ;;  %292 = vmatpush.msra.mxu3 %v71_v2  ;;  %v123_v11 = vunpack.c.0.s8 %v122_v10  ;;  %v125_v13 = vunpack.c.2.s8 %v122_v10  ;;  %v124_v14 = vunpack.c.1.s8 %v122_v10  ;;  %v126_v18 = vunpack.c.3.s8 %v122_v10 }
  0x14   :  { %106 = vmatpush.msra.mxu0 %v70_v3  ;;  %294 = vmatpush.msra.mxu2 %v70_v3 }
  0x15   :  { %280 = vmatmul.msk.f32.vlgmr.msra.gmra.mxu0 %vm78_vm0, %v66_v4  ;;  %282 = vmatmul.msk.f32.vlgmr.msra.gmra.mxu2 %vm78_vm0, %v68_v5  ;;  %v127_v12 = vpack.c.b16 %v123_v11, %v123_v11  ;;  %v131_v16 = vpack.c.b16 %v125_v13, %v125_v13  ;;  %v129_v17 = vpack.c.b16 %v124_v14, %v124_v14 }
  0x16   :  { %293 = vmatpush.msra.mxu1 %v70_v3  ;;  %295 = vmatpush.msra.mxu3 %v70_v3  ;;  %v133_v22 = vpack.c.b16 %v126_v18, %v126_v18 }
  0x17   :  { %281 = vmatmul.msk.f32.vlgmr.msra.gmra.mxu1 %vm78_vm0, %v67_v6  ;;  %283 = vmatmul.msk.f32.vlgmr.msra.gmra.mxu3 %vm78_vm0, %v69_v7  ;;  %v128_v15 = vpack.c.b8 %v127_v12, %v127_v12  ;;  %v132_v19 = vpack.c.b8 %v131_v16, %v131_v16  ;;  %v130_v20 = vpack.c.b8 %v129_v17, %v129_v17 }
  0x18   :  { %v134_v25 = vpack.c.b8 %v133_v22, %v133_v22 }
  0x19   :  { %vm135_vm2 = vnez %v128_v15  ;;  %vm137_vm3 = vnez %v132_v19  ;;  %vm136_vm4 = vnez %v130_v20 }
  0x1a   :  { %v139_v21 = vsel %vm135_vm2, 16843009, %v400_v9  ;;  %v141_v26 = vsel %vm137_vm3, 16843009, %v400_v9  ;;  %v140_v27 = vsel %vm136_vm4, 16843009, %v400_v9  ;;  %vm138_vm6 = vnez %v134_v25 }
  0x1b   :  { %v143_v23 = vunpack.c.0.s8 %v139_v21  ;;  %v145_v31 = vunpack.c.0.s8 %v141_v26  ;;  %v144_v32 = vunpack.c.0.s8 %v140_v27  ;;  %v142_v35 = vsel %vm138_vm6, 16843009, %v400_v9 }
  0x1c   :  { %v146_v39 = vunpack.c.0.s8 %v142_v35  ;;  %vm261_vm2 = vcmask 7168  }
  0x1d   :  { %vm147_vm5 = vcmp.ne.s32.totalorder %v143_v23, 0  ;;  %vm149_vm7 = vcmp.ne.s32.totalorder %v145_v31, 0  ;;  %vm148_vm8 = vcmp.ne.s32.totalorder %v144_v32, 0 }
  0x1e   :  { %vm150_vm9 = vcmp.ne.s32.totalorder %v146_v39, 0 }
  0x92   :  { %v108_v28 = vpop.f32.mrf.mxu0 }
  0x93   :  { %v109_v29 = vadd.f32 %v302_v24, %v108_v28 }
  0x94   :  { %v111_v30 = vpop.f32.mrf.mxu1 }
  0x95   :  { %v151_v33 = vsel %vm147_vm5, %v109_v29, -1e+10  ;;  %v112_v34 = vadd.f32 %v302_v24, %v111_v30 }
  0x96   :  { %157 = vmax.xlane.f32.xlu0 %v151_v33 }
  0x97   :  { %v152_v41 = vsel %vm148_vm8, %v112_v34, -1e+10 }
  0x98   :  { %v114_v36 = vpop.f32.mrf.mxu2 }
  0x99   :  { %v115_v37 = vadd.f32 %v302_v24, %v114_v36 }
  0x9a   :  { %v117_v38 = vpop.f32.mrf.mxu3 }
  0x9b   :  { %v153_v40 = vsel %vm149_vm7, %v115_v37, -1e+10  ;;  %v118_v42 = vadd.f32 %v302_v24, %v117_v38 }
  0x9c   :  { %161 = vmax.xlane.f32.xlu1 %v153_v40 }
  0x9d   :  { %v154_v43 = vsel %vm150_vm9, %v118_v42, -1e+10 }
  0x9e   :  { %159 = vmax.xlane.f32.xlu0 %v152_v41 }
  0xa4   :  { %163 = vmax.xlane.f32.xlu1 %v154_v43 }
 0x109   :  { %v158_v46 = vpop.xlane.xlu0 %157 }
 0x10a   :  { %vm165_vm10 = vcmp.eq.f32.partialorder %v151_v33, %v158_v46  ;;  %v229_v51 = vsub.f32 %v151_v33, %v158_v46 }
 0x10b   :  { %v169_v47 = vsel %vm165_vm10, %v156_v45, 128 }
 0x10c   :  { %v174_v48 = vshra.s32 %v169_v47, 16  ;;  %v233_v60 = vmul.f32 1.442695, %v229_v51  ;;  %v173_v10 = vand.u32 65535, %v169_v47 }
 0x10e   :  { %v176_v49 = vcvt.s32.f32 %v174_v48  ;;  %v175_v12 = vcvt.s32.f32 %v173_v10 }
 0x10f   :  { %v162_v50 = vpop.xlane.xlu1 %161 }
 0x110   :  { %vm167_vm11 = vcmp.eq.f32.partialorder %v153_v40, %v162_v50  ;;  %177 = vmin.xlane.f32.xlu2 %v176_v49  ;;  %v231_v62 = vsub.f32 %v153_v40, %v162_v50 }
 0x111   :  { %v171_v52 = vsel %vm167_vm11, %v156_v45, 128  ;;  %v160_v53 = vpop.xlane.xlu0 %159 }
 0x112   :  { %vm166_vm12 = vcmp.eq.f32.partialorder %v152_v41, %v160_v53  ;;  %v230_v54 = vsub.f32 %v152_v41, %v160_v53  ;;  %v202_v55 = vshra.s32 %v171_v52, 16  ;;  %v237_v3 = vmul.f32 1.442695, %v231_v62 }
 0x113   :  { %v170_v56 = vsel %vm166_vm12, %v156_v45, 128  ;;  %v201_v14 = vand.u32 65535, %v171_v52 }
 0x114   :  { %v235_v57 = vmul.f32 1.442695, %v230_v54  ;;  %v204_v58 = vcvt.s32.f32 %v202_v55  ;;  %v188_v59 = vshra.s32 %v170_v56, 16  ;;  %v187_v15 = vand.u32 65535, %v170_v56 }
 0x115   :  { %v203_v17 = vcvt.s32.f32 %v201_v14 }
 0x116   :  { %303 = vpow2.f32 %v235_v57  ;;  %205 = vmin.xlane.f32.xlu0 %v204_v58  ;;  %v190_v61 = vcvt.s32.f32 %v188_v59  ;;  %v189_v20 = vcvt.s32.f32 %v187_v15 }
 0x117   :  { %v164_v63 = vpop.xlane.xlu1 %163  ;;  %305 = vpow2.f32 %v233_v60 }
 0x118   :  { %vm168_vm13 = vcmp.eq.f32.partialorder %v154_v43, %v164_v63  ;;  %191 = vmin.xlane.f32.xlu2 %v190_v61  ;;  %v232_v1 = vsub.f32 %v154_v43, %v164_v63  ;;  %307 = vpow2.f32 %v237_v3 }
 0x119   :  { %v172_v0 = vsel %vm168_vm13, %v156_v45, 128 }
 0x11a   :  { %v216_v2 = vshra.s32 %v172_v0, 16  ;;  %v239_v6 = vmul.f32 1.442695, %v232_v1  ;;  %v215_v22 = vand.u32 65535, %v172_v0 }
 0x11c   :  { %v304_v4 = vpop.eup %303  ;;  %v218_v5 = vcvt.s32.f32 %v216_v2  ;;  %309 = vpow2.f32 %v239_v6  ;;  %v217_v25 = vcvt.s32.f32 %v215_v22 }
 0x11d   :  { %v306_v7 = vpop.eup %305 }
 0x11e   :  { %219 = vmin.xlane.f32.xlu1 %v218_v5  ;;  %243 = vadd.xlane.f32.xlu0 %v304_v4  ;;  %v308_v8 = vpop.eup %307 }
 0x120   :  { %241 = vadd.xlane.f32.xlu2 %v306_v7 }
 0x122   :  { %v310_v9 = vpop.eup %309 }
 0x126   :  { %245 = vadd.xlane.f32.xlu1 %v308_v8 }
 0x128   :  { %247 = vadd.xlane.f32.xlu2 %v310_v9 }
 0x183   :  { %v178_v11 = vpop.xlane.xlu2 %177 }
 0x184   :  { %vm179_vm14 = vcmp.eq.f32.partialorder %v176_v49, %v178_v11  ;;  %v184_v42 = vcvt.f32.s32 %v178_v11 }
 0x185   :  { %v180_v13 = vsel %vm179_vm14, %v175_v12, inf }
 0x186   :  { %181 = vmin.xlane.f32.xlu0 %v180_v13  ;;  %v185_v44 = vshll.u32 %v184_v42, 16 }
 0x189   :  { %v206_v16 = vpop.xlane.xlu0 %205 }
 0x18a   :  { %vm207_vm15 = vcmp.eq.f32.partialorder %v204_v58, %v206_v16  ;;  %v212_v46 = vcvt.f32.s32 %v206_v16 }
 0x18b   :  { %v192_v18 = vpop.xlane.xlu2 %191  ;;  %v208_v19 = vsel %vm207_vm15, %v203_v17, inf }
 0x18c   :  { %209 = vmin.xlane.f32.xlu2 %v208_v19  ;;  %vm193_vm0 = vcmp.eq.f32.partialorder %v190_v61, %v192_v18  ;;  %v198_v48 = vcvt.f32.s32 %v192_v18  ;;  %v213_v50 = vshll.u32 %v212_v46, 16 }
 0x18d   :  { %v194_v21 = vsel %vm193_vm0, %v189_v20, inf }
 0x18e   :  { %195 = vmin.xlane.f32.xlu1 %v194_v21  ;;  %v199_v53 = vshll.u32 %v198_v48, 16 }
 0x191   :  { %v220_v23 = vpop.xlane.xlu1 %219  ;;  %v244_v24 = vpop.xlane.xlu0 %243 }
 0x192   :  { %311 = vlog2.f32 %v244_v24  ;;  %vm221_vm1 = vcmp.eq.f32.partialorder %v218_v5, %v220_v23  ;;  %v226_v56 = vcvt.f32.s32 %v220_v23 }
 0x193   :  { %v242_v26 = vpop.xlane.xlu2 %241  ;;  %v222_v27 = vsel %vm221_vm1, %v217_v25, inf }
 0x194   :  { %313 = vlog2.f32 %v242_v26  ;;  %223 = vmin.xlane.f32.xlu0 %v222_v27  ;;  %v227_v59 = vshll.u32 %v226_v56, 16 }
 0x198   :  { %v312_v28 = vpop.eup %311 }
 0x199   :  { %v252_v29 = vmul.f32 0.6931472, %v312_v28  ;;  %v246_v30 = vpop.xlane.xlu1 %245 }
 0x19a   :  { %v314_v31 = vpop.eup %313  ;;  %315 = vlog2.f32 %v246_v30 }
 0x19b   :  { %v258_v32 = vsub.f32 0.0, %v252_v29  ;;  %v250_v33 = vmul.f32 0.6931472, %v314_v31  ;;  %v248_v34 = vpop.xlane.xlu2 %247 }
 0x19c   :  { %317 = vlog2.f32 %v248_v34 }
 0x19d   :  { %267 = vst.msk [vmem:[%s480_s5 + $0x8] sm:$0xff] %vm261_vm2, %v258_v32  ;;  %v257_v35 = vsub.f32 0.0, %v250_v33 }
 0x19f   :  { %266 = vst.msk [vmem:[%s480_s5] sm:$0xff] %vm261_vm2, %v257_v35 }
 0x1a0   :  { %v316_v36 = vpop.eup %315 }
 0x1a1   :  { %v254_v37 = vmul.f32 0.6931472, %v316_v36 }
 0x1a2   :  { %v318_v38 = vpop.eup %317 }
 0x1a3   :  { %v259_v39 = vsub.f32 0.0, %v254_v37  ;;  %v256_v40 = vmul.f32 0.6931472, %v318_v38 }
 0x1a5   :  { %268 = vst.msk [vmem:[%s480_s5 + $0x10] sm:$0xff] %vm261_vm2, %v259_v39  ;;  %v260_v41 = vsub.f32 0.0, %v256_v40 }
 0x1a7   :  { %269 = vst.msk [vmem:[%s480_s5 + $0x18] sm:$0xff] %vm261_vm2, %v260_v41 }
 0x1f9   :  { %v182_v43 = vpop.xlane.xlu0 %181 }
 0x1fa   :  { %v183_v45 = vcvt.f32.s32 %v182_v43 }
 0x1fc   :  { %v186_v47 = vadd.s32 %v185_v44, %v183_v45 }
 0x1fe   :  { %262 = vst.msk [vmem:[%s479_s4] sm:$0xff] %vm261_vm2, %v186_v47 }
 0x1ff   :  { %v210_v49 = vpop.xlane.xlu2 %209 }
 0x200   :  { %v211_v51 = vcvt.f32.s32 %v210_v49 }
 0x201   :  { %v196_v52 = vpop.xlane.xlu1 %195 }
 0x202   :  { %v214_v54 = vadd.s32 %v213_v50, %v211_v51  ;;  %v197_v55 = vcvt.f32.s32 %v196_v52 }
 0x204   :  { %264 = vst.msk [vmem:[%s479_s4 + $0x10] sm:$0xff] %vm261_vm2, %v214_v54  ;;  %v200_v57 = vadd.s32 %v199_v53, %v197_v55 }
 0x206   :  { %263 = vst.msk [vmem:[%s479_s4 + $0x8] sm:$0xff] %vm261_vm2, %v200_v57 }
 0x207   :  { %v224_v58 = vpop.xlane.xlu0 %223 }
 0x208   :  { %v225_v60 = vcvt.f32.s32 %v224_v58 }
 0x20a   :  { %v228_v61 = vadd.s32 %v227_v59, %v225_v60 }
 0x20c   :  { %265 = vst.msk [vmem:[%s479_s4 + $0x18] sm:$0xff] %vm261_vm2, %v228_v61 }
 0x20d   :  { %278 = vsyncpa [#allocation3], 1 }
 0x20e   :  { %279 = vsyncpa [#allocation5], 1 }

</bundles_post_ra>
